<compile_context>
chip_gen: v5e
topology: v5e:2x2
jax: 0.10.0
libtpu: 0.0.40
codegen_flags: <defaults>
</compile_context>

<pallas_src>
import jax
import jax.numpy as jnp
from jax.experimental import pallas as pl
from jax.experimental.pallas import tpu as pltpu


def _round_up(x, m):
    return (x + m - 1) // m * m


def _vmem_capacity_bytes():
    """Best-effort VMEM capacity query; conservative fallback (v7x per-TC)."""
    try:
        return int(pltpu.get_tpu_info().vmem_capacity_bytes)
    except Exception:
        return 64 * 1024 * 1024


# --------- Stage 1: hn = LayerNorm(ReLU(masked_X @ W1 + b1)), bf16 out --------

def _hidden_kernel(x_ref, w1_ref, b1_ref, g_ref, beta_ref, hn_ref):
    # x_ref: (tm, num_inputs) bf16, w1_ref: (num_inputs, H) bf16
    # b1/g/beta: (1, H) f32, hn_ref: (tm, H) bf16
    h = jnp.dot(x_ref[...], w1_ref[...], preferred_element_type=jnp.float32)
    h = jnp.maximum(h + b1_ref[...], 0.0)                      # bias + ReLU (VPU)
    mean = jnp.mean(h, axis=-1, keepdims=True)                 # LN stats in f32
    var = jnp.mean(jnp.square(h - mean), axis=-1, keepdims=True)
    # NOTE: zero-padded M rows reach var == 0 here; rsqrt(1e-5) of a constant
    # row is finite and those rows are sliced off by the caller (benign, do not
    # "fix" into a NaN-avoidance path).
    hn = (h - mean) * jax.lax.rsqrt(var + 1e-5)                # nn.LayerNorm default eps
    hn_ref[...] = (hn * g_ref[...] + beta_ref[...]).astype(hn_ref.dtype)


# --------- Stage 2: logits = hn @ W2 + b2 (vocab-streamed, both axes parallel) -

def _vocab_proj_kernel(hn_ref, w2_ref, b2_ref, o_ref):
    # hn_ref: (tm, H) bf16, w2_ref: (H, tv) bf16, b2_ref: (1, tv) f32
    y = jnp.dot(hn_ref[...], w2_ref[...], preferred_element_type=jnp.float32)
    o_ref[...] = (y + b2_ref[...]).astype(o_ref.dtype)


def masklm_forward(X, pred_positions, params, *, tm_max=2048, tv_max=None,
                   matmul_dtype=jnp.bfloat16, out_dtype=jnp.bfloat16):
    """MaskLM forward: gather masked positions, then the MLP as Pallas kernels.

    out_dtype defaults to bf16 (the logits write rivals the W2 read on a
    memory-bound kernel); pass out_dtype=X.dtype for f32 parity with torch.
    """
    w1, b1, gamma, beta, w2, b2 = params
    batch_size, seq_len, num_inputs = X.shape
    num_pred = pred_positions.shape[1]

    H = w1.shape[1]
    V = w2.shape[1]
    M = batch_size * num_pred

    vmem_cap = _vmem_capacity_bytes()
    big_vmem = vmem_cap >= 96 * 1024 * 1024          # v5e/v6e (128 MiB) vs v7x (64 MiB)
    if tv_max is None:
        tv_max = 4096 if big_vmem else 2048
    vmem_limit = (96 if big_vmem else 48) * 1024 * 1024

    # ---- Gather the masked positions (plain-JAX glue == X[batch_idx, pos]) ----
    # TODO(synk): could be fused via PrefetchScalarGridSpec + pl.Element row
    # gather; it is tiny relative to W2 / logits HBM traffic, so kept as glue.
    batch_idx = jnp.repeat(jnp.arange(batch_size), num_pred)
    pos = pred_positions.reshape(-1)
    masked_X = X[batch_idx, pos].astype(matmul_dtype)          # (M, num_inputs)

    # ---- Tile sizing: one M tile covers (almost) all of M -> W2 read once ----
    tm = min(tm_max, _round_up(M, 256))                        # MXU / bf16-pack aligned
    tv = min(tv_max, _round_up(V, 128))                        # lane-dense vocab tile

    out_bytes = jnp.dtype(out_dtype).itemsize

    def _stage2_vmem(tm_, tv_):
        # double-buffered logits / W2 / b2 tiles + resident hn tile (bf16)
        return 2 * (tm_ * tv_ * out_bytes + H * tv_ * 2 + tv_ * 4) + 2 * tm_ * H * 2

    while tv > 128 and _stage2_vmem(tm, tv) > int(0.8 * vmem_limit):
        tv = max(128, _round_up(tv // 2, 128))                 # re-budget for 64 MiB v7x VMEM

    M_pad = _round_up(M, tm)
    V_pad = _round_up(V, tv)

    if M_pad != M:
        masked_X = jnp.pad(masked_X, ((0, M_pad - M), (0, 0)))

    w1_c = w1.astype(matmul_dtype)
    b1_c = b1.reshape(1, H).astype(jnp.float32)
    g_c = gamma.reshape(1, H).astype(jnp.float32)
    beta_c = beta.reshape(1, H).astype(jnp.float32)
    w2_c = w2.astype(matmul_dtype)
    b2_c = b2.reshape(1, V).astype(jnp.float32)
    if V_pad != V:
        w2_c = jnp.pad(w2_c, ((0, 0), (0, V_pad - V)))
        b2_c = jnp.pad(b2_c, ((0, 0), (0, V_pad - V)))

    num_m = M_pad // tm
    num_v = V_pad // tv

    # ---- Stage 1: (M_pad, H) bf16 hidden activations -------------------------
    hn = pl.pallas_call(
        _hidden_kernel,
        out_shape=jax.ShapeDtypeStruct((M_pad, H), matmul_dtype),
        grid_spec=pltpu.PrefetchScalarGridSpec(
            num_scalar_prefetch=0,
            grid=(num_m,),
            in_specs=[
                pl.BlockSpec((tm, num_inputs), lambda m: (m, 0)),   # masked_X tile
                pl.BlockSpec((num_inputs, H), lambda m: (0, 0)),    # W1 (resident)
                pl.BlockSpec((1, H), lambda m: (0, 0)),             # b1
                pl.BlockSpec((1, H), lambda m: (0, 0)),             # LN gamma
                pl.BlockSpec((1, H), lambda m: (0, 0)),             # LN beta
            ],
            out_specs=pl.BlockSpec((tm, H), lambda m: (m, 0)),
        ),
        compiler_params=pltpu.CompilerParams(
            dimension_semantics=("parallel",),
            vmem_limit_bytes=vmem_limit,
        ),
        cost_estimate=pl.CostEstimate(
            flops=2 * M_pad * num_inputs * H,
            transcendentals=M_pad,
            bytes_accessed=(M_pad * num_inputs * 2 + num_inputs * H * 2
                            + 3 * H * 4 + M_pad * H * 2),
        ),
    )(masked_X, w1_c, b1_c, g_c, beta_c)

    # ---- Stage 2: logits. Vocab axis is OUTER + parallel, so W2 is streamed
    # from HBM exactly once and the two v7x TensorCores each take a vocab half;
    # the hn tile index is constant w.r.t. the vocab axis and stays resident. --
    out = pl.pallas_call(
        _vocab_proj_kernel,
        out_shape=jax.ShapeDtypeStruct((M_pad, V_pad), out_dtype),
        grid_spec=pltpu.PrefetchScalarGridSpec(
            num_scalar_prefetch=0,
            grid=(num_v, num_m),
            in_specs=[
                pl.BlockSpec((tm, H), lambda v, m: (m, 0)),         # hn tile (bf16)
                pl.BlockSpec((H, tv), lambda v, m: (0, v)),         # W2 vocab tile (streamed)
                pl.BlockSpec((1, tv), lambda v, m: (0, v)),         # b2 vocab tile
            ],
            out_specs=pl.BlockSpec((tm, tv), lambda v, m: (m, v)),  # logits tile (bf16)
        ),
        compiler_params=pltpu.CompilerParams(
            dimension_semantics=("parallel", "parallel"),
            vmem_limit_bytes=vmem_limit,
        ),
        cost_estimate=pl.CostEstimate(
            flops=2 * M_pad * H * V_pad,
            transcendentals=0,
            bytes_accessed=(M_pad * H * 2 + H * V_pad * 2 + V_pad * 4
                            + M_pad * V_pad * out_bytes),
        ),
    )(hn, w2_c, b2_c)

    return out[:M, :V].reshape(batch_size, num_pred, V)


def masklm_reference(X, pred_positions, params, matmul_dtype=jnp.bfloat16,
                     out_dtype=jnp.bfloat16):
    """Pure-JAX reference mirroring the kernel's bf16 matmul / f32 LN numerics."""
    w1, b1, gamma, beta, w2, b2 = params
    B = X.shape[0]
    P = pred_positions.shape[1]
    batch_idx = jnp.repeat(jnp.arange(B), P)
    masked_X = X[batch_idx, pred_positions.reshape(-1)].astype(matmul_dtype)
    h = jnp.dot(masked_X, w1.astype(matmul_dtype),
                preferred_element_type=jnp.float32)
    h = jnp.maximum(h + b1.reshape(1, -1).astype(jnp.float32), 0.0)
    mean = jnp.mean(h, axis=-1, keepdims=True)
    var = jnp.mean(jnp.square(h - mean), axis=-1, keepdims=True)
    hn = (h - mean) * jax.lax.rsqrt(var + 1e-5)
    hn = hn * gamma.reshape(1, -1).astype(jnp.float32) + beta.reshape(1, -1).astype(jnp.float32)
    hn = hn.astype(matmul_dtype)
    y = jnp.dot(hn, w2.astype(matmul_dtype), preferred_element_type=jnp.float32)
    y = y + b2.reshape(1, -1).astype(jnp.float32)
    return y.astype(out_dtype).reshape(B, P, -1)


if __name__ == "__main__":
    # Small synthetic shapes consistent with the module. vocab_size is NOT a
    # multiple of 128 and batch*num_pred is NOT a multiple of the M tile so the
    # padding + multi-tile code paths are exercised (stage-2 grid = (3, 2)).
    batch_size = 4
    seq_len = 16
    num_inputs = 32       # stand-in for 768
    num_hiddens = 32
    vocab_size = 300
    num_pred = 5

    key = jax.random.PRNGKey(0)
    k_x, k_p, k_w1, k_b1, k_w2, k_b2 = jax.random.split(key, 6)

    X = jax.random.normal(k_x, (batch_size, seq_len, num_inputs), dtype=jnp.float32)
    pred_positions = jax.random.randint(
        k_p, (batch_size, num_pred), 0, seq_len, dtype=jnp.int32)

    # Deterministic parameter init (nn.LayerNorm defaults: gamma=1, beta=0).
    w1 = jax.random.normal(k_w1, (num_inputs, num_hiddens), dtype=jnp.float32) * 0.02
    b1 = jax.random.normal(k_b1, (1, num_hiddens), dtype=jnp.float32) * 0.02
    gamma = jnp.ones((1, num_hiddens), dtype=jnp.float32)
    beta = jnp.zeros((1, num_hiddens), dtype=jnp.float32)
    w2 = jax.random.normal(k_w2, (num_hiddens, vocab_size), dtype=jnp.float32) * 0.02
    b2 = jax.random.normal(k_b2, (1, vocab_size), dtype=jnp.float32) * 0.02
    params = (w1, b1, gamma, beta, w2, b2)

    y_ref = masklm_reference(X, pred_positions, params)

    # Small tiles: exercises M padding (20 -> 32) and the multi-tile grid.
    y_small = masklm_forward(X, pred_positions, params, tm_max=16, tv_max=128)
    y_small = jax.block_until_ready(y_small)
    # Default (production) tile plan: one M tile, vocab streamed once.
    y_big = masklm_forward(X, pred_positions, params)
    y_big = jax.block_until_ready(y_big)

    assert y_small.shape == (batch_size, num_pred, vocab_size)
    assert y_big.shape == (batch_size, num_pred, vocab_size)
    for y in (y_small, y_big):
        yf = y.astype(jnp.float32)
        rf = y_ref.astype(jnp.float32)
        assert jnp.allclose(yf, rf, atol=5e-3, rtol=5e-3), float(jnp.max(jnp.abs(yf - rf)))

    print("KERNEL_OK")
</pallas_src>

<mosaic_0001>
module attributes {stable_mosaic.version = 11 : i64} {
  func.func @_hidden_kernel(%arg0: i32, %arg1: memref<16x32xbf16, #tpu.memory_space<vmem>>, %arg2: memref<32x32xbf16, #tpu.memory_space<vmem>>, %arg3: memref<1x32xf32, #tpu.memory_space<vmem>>, %arg4: memref<1x32xf32, #tpu.memory_space<vmem>>, %arg5: memref<1x32xf32, #tpu.memory_space<vmem>>, %arg6: memref<16x32xbf16, #tpu.memory_space<vmem>>) attributes {dimension_semantics = [#tpu.dimension_semantics<parallel>], iteration_bounds = array<i64: 2>, scalar_prefetch = 0 : i64, scratch_operands = 0 : i64, tpu.core_type = #tpu.core_type<tc>, window_params = [{transform_indices = @transform_0, window_bounds = array<i64: 16, 32>}, {pipeline_mode = #tpu.pipeline_mode<synchronous>, transform_indices = @transform_1, window_bounds = array<i64: 32, 32>}, {pipeline_mode = #tpu.pipeline_mode<synchronous>, transform_indices = @transform_2, window_bounds = array<i64: 1, 32>}, {pipeline_mode = #tpu.pipeline_mode<synchronous>, transform_indices = @transform_3, window_bounds = array<i64: 1, 32>}, {pipeline_mode = #tpu.pipeline_mode<synchronous>, transform_indices = @transform_4, window_bounds = array<i64: 1, 32>}, {transform_indices = @transform_5, window_bounds = array<i64: 16, 32>}]} {
    %c0 = arith.constant 0 : index
    %c0_0 = arith.constant 0 : index
    %0 = vector.load %arg1[%c0, %c0_0] : memref<16x32xbf16, #tpu.memory_space<vmem>>, vector<16x32xbf16>
    %c0_1 = arith.constant 0 : index
    %c0_2 = arith.constant 0 : index
    %1 = vector.load %arg2[%c0_1, %c0_2] : memref<32x32xbf16, #tpu.memory_space<vmem>>, vector<32x32xbf16>
    %cst = arith.constant dense<0.000000e+00> : vector<16x32xf32>
    %2 = tpu.matmul %0, %1, %cst {dimension_numbers = #tpu.dot_dimension_numbers<[1], [0], [0], [1], [0, 0, 1, 1], [], []>} : vector<16x32xbf16>, vector<32x32xbf16>, vector<16x32xf32> -> vector<16x32xf32>
    %c0_3 = arith.constant 0 : index
    %c0_4 = arith.constant 0 : index
    %3 = vector.load %arg3[%c0_3, %c0_4] : memref<1x32xf32, #tpu.memory_space<vmem>>, vector<1x32xf32>
    %4 = vector.broadcast %3 : vector<1x32xf32> to vector<16x32xf32>
    %5 = arith.addf %2, %4 : vector<16x32xf32>
    %cst_5 = arith.constant 0.000000e+00 : f32
    %6 = vector.broadcast %cst_5 : f32 to vector<16x32xf32>
    %7 = arith.maximumf %5, %6 : vector<16x32xf32>
    %cst_6 = arith.constant dense<0.000000e+00> : vector<16xf32>
    %8 = vector.multi_reduction <add>, %7, %cst_6 [1] : vector<16x32xf32> to vector<16xf32>
    %9 = vector.shape_cast %8 : vector<16xf32> to vector<16x1xf32>
    %cst_7 = arith.constant 3.200000e+01 : f32
    %10 = vector.broadcast %cst_7 : f32 to vector<16x1xf32>
    %11 = arith.divf %9, %10 : vector<16x1xf32>
    %12 = vector.broadcast %11 : vector<16x1xf32> to vector<16x32xf32>
    %13 = arith.subf %7, %12 : vector<16x32xf32>
    %14 = arith.mulf %13, %13 : vector<16x32xf32>
    %cst_8 = arith.constant dense<0.000000e+00> : vector<16xf32>
    %15 = vector.multi_reduction <add>, %14, %cst_8 [1] : vector<16x32xf32> to vector<16xf32>
    %16 = vector.shape_cast %15 : vector<16xf32> to vector<16x1xf32>
    %cst_9 = arith.constant 3.200000e+01 : f32
    %17 = vector.broadcast %cst_9 : f32 to vector<16x1xf32>
    %18 = arith.divf %16, %17 : vector<16x1xf32>
    %19 = vector.broadcast %11 : vector<16x1xf32> to vector<16x32xf32>
    %20 = arith.subf %7, %19 : vector<16x32xf32>
    %cst_10 = arith.constant 9.99999974E-6 : f32
    %21 = vector.broadcast %cst_10 : f32 to vector<16x1xf32>
    %22 = arith.addf %18, %21 : vector<16x1xf32>
    %23 = math.rsqrt %22 : vector<16x1xf32>
    %24 = vector.broadcast %23 : vector<16x1xf32> to vector<16x32xf32>
    %25 = arith.mulf %20, %24 : vector<16x32xf32>
    %c0_11 = arith.constant 0 : index
    %c0_12 = arith.constant 0 : index
    %26 = vector.load %arg4[%c0_11, %c0_12] : memref<1x32xf32, #tpu.memory_space<vmem>>, vector<1x32xf32>
    %27 = vector.broadcast %26 : vector<1x32xf32> to vector<16x32xf32>
    %28 = arith.mulf %25, %27 : vector<16x32xf32>
    %c0_13 = arith.constant 0 : index
    %c0_14 = arith.constant 0 : index
    %29 = vector.load %arg5[%c0_13, %c0_14] : memref<1x32xf32, #tpu.memory_space<vmem>>, vector<1x32xf32>
    %30 = vector.broadcast %29 : vector<1x32xf32> to vector<16x32xf32>
    %31 = arith.addf %28, %30 : vector<16x32xf32>
    %32 = arith.truncf %31 : vector<16x32xf32> to vector<16x32xbf16>
    %c0_15 = arith.constant 0 : index
    %c0_16 = arith.constant 0 : index
    %33 = vector.load %arg6[%c0_15, %c0_16] : memref<16x32xbf16, #tpu.memory_space<vmem>>, vector<16x32xbf16>
    tpu.vector_store %arg6[%c0_15, %c0_16], %32 {strides = array<i32>} : memref<16x32xbf16, #tpu.memory_space<vmem>>, vector<16x32xbf16>,
    return
  }
  func.func @transform_0(%arg0: i32) -> (i32, i32) {
    %c0_i32 = arith.constant 0 : i32
    %c0_i32_0 = arith.constant 0 : i32
    return %arg0, %c0_i32 : i32, i32
  }
  func.func @transform_1(%arg0: i32) -> (i32, i32) {
    %c0_i32 = arith.constant 0 : i32
    %c0_i32_0 = arith.constant 0 : i32
    %c0_i32_1 = arith.constant 0 : i32
    return %c0_i32, %c0_i32_0 : i32, i32
  }
  func.func @transform_2(%arg0: i32) -> (i32, i32) {
    %c0_i32 = arith.constant 0 : i32
    %c0_i32_0 = arith.constant 0 : i32
    %c0_i32_1 = arith.constant 0 : i32
    return %c0_i32, %c0_i32_0 : i32, i32
  }
  func.func @transform_3(%arg0: i32) -> (i32, i32) {
    %c0_i32 = arith.constant 0 : i32
    %c0_i32_0 = arith.constant 0 : i32
    %c0_i32_1 = arith.constant 0 : i32
    return %c0_i32, %c0_i32_0 : i32, i32
  }
  func.func @transform_4(%arg0: i32) -> (i32, i32) {
    %c0_i32 = arith.constant 0 : i32
    %c0_i32_0 = arith.constant 0 : i32
    %c0_i32_1 = arith.constant 0 : i32
    return %c0_i32, %c0_i32_0 : i32, i32
  }
  func.func @transform_5(%arg0: i32) -> (i32, i32) {
    %c0_i32 = arith.constant 0 : i32
    %c0_i32_0 = arith.constant 0 : i32
    return %arg0, %c0_i32 : i32, i32
  }
}

</mosaic_0001>

<bundles_post_ra>
// kernel: tpu_custom_call.1
= control target key start
LH: loop header
LB: loop body
LE: loop exit
PB: predicated region body
PF: predicated region fallthrough
CT: control target
= control target key end

     0   :  { %10 = vsyncpa [#allocation3], 0  ;;  %s914_s0 = inlined_call_operand.hbm [shape: bf16[32,32], index: 0, kind: input, shape index: {}]   ;;  %s915_s1 = inlined_call_operand.hbm [shape: bf16[32,32], index: 1, kind: input, shape index: {}]   ;;  %s916_s2 = inlined_call_operand.vmem [shape: f32[1,32], index: 2, kind: input, shape index: {}]   ;;  %s917_s3 = inlined_call_operand.vmem [shape: f32[1,32], index: 3, kind: input, shape index: {}]   ;;  %s918_s4 = inlined_call_operand.vmem [shape: f32[1,32], index: 4, kind: input, shape index: {}]   ;;  %s919_s5 = inlined_call_operand.hbm [shape: bf16[32,32], index: 5, kind: output, shape index: {}]  }
   0x1   :  { %12 = vsyncpa [#allocation3 + $0x1], 0 }
   0x2   :  { %13 = vsyncpa [#allocation6], 0 }
   0x3   :  { %14 = vsyncpa [#allocation4], 0 }
   0x4   :  { %16 = vsyncpa [#allocation4 + $0x1], 0  ;;  %s752_s18 = smov 0   ;;  %s754_s19 = smov 0  }
   0x5   :  { %s756_s20 = smov 0   ;;  %s758_s21 = smov 0  }
   0x6 LB: > { %s773_s22 = sadd.s32 4294967295, %s714_s21   ;;  %s479_s23 = sadd.s32 4294967294, %s714_s21   ;;  %s714_s21 = sphi %s758_s21, %s931_s21   ;;  %s710_s20 = sphi %s756_s20, %s930_s20   ;;  %s706_s19 = sphi %s754_s19, %s929_s19   ;;  %s702_s18 = sphi %s752_s18, %s928_s18  }
   0x7   : > { %p42_p0 = scmp.ne.s32.totalorder %s706_s19, %s702_s18  ;;  %p43_p1 = scmp.eq.s32.totalorder %s773_s22, 0 }
   0x8   : > { %p150_p2 = scmp.eq.s32.totalorder %s773_s22, 1  ;;  %p156_p3 = scmp.eq.s32.totalorder %s479_s23, 1 }
   0x9   : > { %p782_p4 = por %p43_p1, %p42_p0  ;;  %p480_p5 = scmp.ge.s32.totalorder %s714_s21, 1 }
   0xa   : > { %p787_p6 = por %p156_p3, %p42_p0  ;;  %p163_p7 = scmp.lt.s32.totalorder %s714_s21, 3 }
   0xb   : > { %s174_s28 = sshll.u32 %s915_s1, 4  ;;  %s716_s30 = smov [#allocation5]   ;;  %s175_s28 = int_to_ptr.hbm [resolvable:$true] %s174_s28 }
   0xc   : > { %p795_p8 = pnand %p480_p5, %p163_p7  ;;  %s176_s6 = sshll.u32 %s716_s30, 4  ;;  %s177_s6 = int_to_ptr.vmem [resolvable:$true] %s176_s6 }
   0xd   : > { %s805_s7 = sadd.s32 1, %s714_s21   ;;  %s920_s8 = smov 64  }
   0xe   : > { %p521_p9 = pneg %p795_p8  ;;  %s718_s9 = smov 4  }
   0xf   : > { %s26_s10 = ssub.s32 %s714_s21, %s805_s7  ;;  %s29_s11 = sadd.s32 1, %s710_s20 }
  0x10   : > { %p522_p10 = pnand %p521_p9, %p43_p1  ;;  %p27_p12 = scmp.eq.s32.totalorder %s26_s10, 0 }
  0x11   : > { %p36_p13 = scmp.ne.s32.totalorder %s710_s20, %s706_s19  ;;  %p37_p0 = scmp.eq.s32.totalorder %s714_s21, 0 }
  0x12   : > { %524 = dma.hbm_to_vmem [thread:$0]  (!%p522_p10), %s175_s28, 256, %s177_s6, [#allocation6], %s920_s8, %s920_s8, %s718_s9  }
  0x13   : > { %s817_s12 = scalar_select %p27_p12, %s710_s20, %s29_s11  }
  0x14   : > { %p821_p3 = por %p150_p2, %p36_p13  ;;  %p534_p5 = scmp.lt.s32.totalorder %s714_s21, 2 }
  0x15   : > { %s199_s14 = sand.u32 1, %s710_s20   ;;  %s508_s15 = sshll.u32 %s714_s21, 3 }
  0x16   : > { %p38_p7 = por %p37_p0, %p36_p13  ;;  %s483_s16 = sshll.u32 %s199_s14, 3 }
  0x17   : > { %s208_s26 = scalar_lea.hbm %s914_s0, %s508_s15  ;;  %s203_s28 = scalar_lea.vmem [#allocation2], %s483_s16 }
  0x18   : > { %s209_s27 = sshll.u32 %s208_s26, 4  ;;  %s211_s30 = sshll.u32 %s203_s28, 4  ;;  %s210_s27 = int_to_ptr.hbm [resolvable:$true] %s209_s27  ;;  %s212_s30 = int_to_ptr.vmem [resolvable:$true] %s211_s30 }
  0x19   : > { %p831_p9 = pnand %p534_p5, %p38_p7  ;;  %s200_s10 = scalar_lea.sflag [#allocation3], %s199_s14 }
  0x1a   : > { %s614_s11 = sshra.s32 %s210_s27, 4  ;;  %s621_s16 = scalar_lea.hbm %s914_s0, 16  ;;  %s615_s11 = int_to_ptr.hbm [resolvable:$true] %s614_s11 }
  0x1b   : > { %s616_s8 = scalar_lea.hbm %s615_s11, 8  ;;  %p618_p10 = pneg %p831_p9 }
  0x1c   : > { %p617_p2 = scmp.ne.s32.totalorder %s615_s11, %s616_s8  ;;  %p622_p0 = scmp.lt.s32.totalorder %s615_s11, %s914_s0 }
  0x1d   : > { %p623_p5 = scmp.lt.s32.totalorder %s621_s16, %s616_s8 }
  0x1e   : > { %p619_p12 = pnand %p618_p10, %p617_p2 }
  0x1f   : > { %p624_p7 = por %p623_p5, %p622_p0 }
  0x20   : > { %p620_p13 = pneg %p619_p12 }
  0x22   : > { %p625_p11 = pnand %p624_p7, %p620_p13 }
  0x24   : > { %628 = shalt.err (!%p625_p11)
}
  0x25   : > { %s926_s14 = smov 64   ;;  %223 = sbr.rel (%p795_p8) target bundleno = 465 (0x1d1), region = 40 }
  0x26   : > { %528 = dma.hbm_to_vmem [thread:$0]  (!%p831_p9), %s210_s27, 128, %s212_s30, %s200_s10, %s926_s14, %s926_s14, %s718_s9  }
  0x27   : > { %s851_s28 = sand.u32 (!%p795_p8), 1, %s706_s19  }
  0x28   : > { %s487_s8 = sshll.u32 (!%p795_p8), %s851_s28, 3  ;;  %s226_s11 = scalar_lea.sflag (!%p795_p8), [#allocation3], %s851_s28 }
  0x29   : > { %s229_s15 = scalar_lea.vmem (!%p795_p8), [#allocation2], %s487_s8 }
  0x2a   : > { %689 = dma.done.wait (%p782_p4), %s226_s11, 128  }
  0x2b   : > { %691 = vsyncadd (%p782_p4), %s226_s11, 4294967168 }
  0x2c   : > { %693 = dma.done.wait (%p43_p1), [#allocation6], 256  }
  0x2d   : > { %695 = vsyncadd (%p43_p1), [#allocation6], 4294967040  ;;  %v511_v0 = vld [vmem:[#allocation5 + $0x8] sm:$0xff]  ;;  %v510_v1 = vld [vmem:[#allocation5] sm:$0xff]  ;;  %vm292_vm0 = vcmask 261120   ;;  %v719_v12 = vmov 32.0  }
  0x2e   : > { %302 = vmatpush.bf16.msra.mxu0 %v511_v0  ;;  %v509_v2 = vld [vmem:[%s229_s15] sm:$0xff]  ;;  %578 = vrcp.f32 %v719_v12  ;;  %s512_s10 = sshll.u32 %s773_s22, 3  ;;  %vm377_vm7 = vcmask 257024   ;;  %s261_s26 = scalar_lea.vmem [#allocation7], %s487_s8 }
  0x2f   : > { %v575_v3 = vld [vmem:[%s916_s2] ss:$0 sm:$0xff]  ;;  %s392_s23 = scalar_lea.hbm %s919_s5, %s512_s10  ;;  %s393_s14 = sshll.u32 %s261_s26, 4  ;;  %s394_s14 = int_to_ptr.vmem [resolvable:$true] %s393_s14 }
  0x30   : > { %v576_v43 = vld [vmem:[%s917_s3] ss:$0 sm:$0xff]  ;;  %s395_s11 = sshll.u32 %s392_s23, 4  ;;  %s381_s22 = scalar_lea.sflag [#allocation4], %s851_s28  ;;  %s396_s11 = int_to_ptr.hbm [resolvable:$true] %s395_s11 }
  0x31   : > { %v577_v46 = vld [vmem:[%s918_s4] ss:$0 sm:$0xff]  ;;  %s658_s15 = sshra.s32 %s396_s11, 4  ;;  %s664_s8 = scalar_lea.hbm %s919_s5, 16  ;;  %s659_s15 = int_to_ptr.hbm [resolvable:$true] %s658_s15 }
  0x32   : > { %303 = vmatpush.bf16.msra.mxu0 %v510_v1  ;;  %s660_s29 = scalar_lea.hbm %s659_s15, 8  ;;  %p665_p11 = scmp.lt.s32.totalorder %s659_s15, %s919_s5 }
  0x33   : > { %p661_p1 = scmp.ne.s32.totalorder %s659_s15, %s660_s29  ;;  %p666_p9 = scmp.lt.s32.totalorder %s664_s8, %s660_s29 }
  0x34   : > { %v579_v13 = vpop.eup %578 }
  0x35   : > { %502 = vmatmul.msk.bf16.vlgmr.msra.gmra.mxu0 %vm292_vm0, %v509_v2  ;;  %v319_v14 = vmul.f32 32.0, %v579_v13  ;;  %vm323_vm1 = vweird.f32 %v579_v13  ;;  %p662_p4 = pnand %p661_p1, %p821_p3  ;;  %p667_p2 = por %p666_p9, %p665_p11 }
  0x37   : > { %v320_v15 = vsub.f32 1.0, %v319_v14  ;;  %p663_p8 = pneg %p662_p4 }
  0x39   : > { %v321_v16 = vmul.f32 %v579_v13, %v320_v15  ;;  %p668_p10 = pnand %p667_p2, %p663_p8 }
  0x3b   : > { %v322_v17 = vadd.f32 %v579_v13, %v321_v16 }
  0x3d   : > { %v324_v18 = vsel %vm323_vm1, %v579_v13, %v322_v17 }
  0xb2   : > { %v305_v4 = vpop.f32.mrf.mxu0 }
  0xb3   : > { %v306_v5 = vadd.f32 %v575_v3, %v305_v4 }
  0xb5   : > { %v310_v6 = vmax.f32 %v306_v5, 0.0 }
  0xb7   : > { %v312_v7 = vsel %vm292_vm0, %v310_v6, 0.0 }
  0xb8   : > { %313 = vadd.xlane.f32.xlu0 %v312_v7 }
  0xba   : > { %v307_v8 = vpop.f32.mrf.mxu0 }
  0xbb   : > { %v308_v9 = vadd.f32 %v575_v3, %v307_v8 }
  0xbd   : > { %v311_v10 = vmax.f32 %v308_v9, 0.0 }
  0xbf   : > { %v315_v11 = vsel %vm292_vm0, %v311_v10, 0.0 }
  0xc0   : > { %316 = vadd.xlane.f32.xlu0 %v315_v11 }
 0x12b   : > { %v314_v19 = vpop.xlane.xlu0 %313 }
 0x12c   : > { %v325_v20 = vmul.f32 %v324_v18, %v314_v19 }
 0x12e   : > { %v327_v21 = vsub.f32 %v310_v6, %v325_v20 }
 0x130   : > { %v329_v22 = vmul.f32 %v327_v21, %v327_v21 }
 0x132   : > { %v331_v23 = vsel %vm292_vm0, %v329_v22, 0.0 }
 0x133   : > { %332 = vadd.xlane.f32.xlu1 %v331_v23  ;;  %v317_v24 = vpop.xlane.xlu0 %316 }
 0x134   : > { %v326_v25 = vmul.f32 %v324_v18, %v317_v24 }
 0x136   : > { %v328_v26 = vsub.f32 %v311_v10, %v326_v25 }
 0x138   : > { %v330_v27 = vmul.f32 %v328_v26, %v328_v26 }
 0x13a   : > { %v334_v28 = vsel %vm292_vm0, %v330_v27, 0.0 }
 0x13b   : > { %335 = vadd.xlane.f32.xlu1 %v334_v28 }
 0x1a6   : > { %v333_v29 = vpop.xlane.xlu1 %332 }
 0x1a7   : > { %v337_v30 = vmul.f32 %v333_v29, %v324_v18 }
 0x1a9   : > { %v339_v31 = vadd.f32 1e-05, %v337_v30 }
 0x1ab   : > { %580 = vrsqrt.f32 %v339_v31  ;;  %vm347_vm3 = vweird.f32 %v339_v31 }
 0x1ae   : > { %v336_v32 = vpop.xlane.xlu1 %335 }
 0x1af   : > { %v338_v33 = vmul.f32 %v336_v32, %v324_v18 }
 0x1b1   : > { %v581_v34 = vpop.eup %580  ;;  %v340_v35 = vadd.f32 1e-05, %v338_v33 }
 0x1b2   : > { %v342_v36 = vmul.f32 %v581_v34, %v339_v31  ;;  %vm348_vm2 = vweird.f32 %v581_v34 }
 0x1b3   : > { %582 = vrsqrt.f32 %v340_v35  ;;  %vm349_vm4 = vmor %vm347_vm3, %vm348_vm2  ;;  %vm357_vm6 = vweird.f32 %v340_v35 }
 0x1b4   : > { %v343_v37 = vmul.f32 %v581_v34, %v342_v36 }
 0x1b6   : > { %v344_v38 = vmul.f32 0.5, %v343_v37 }
 0x1b8   : > { %v345_v39 = vsub.f32 1.5, %v344_v38 }
 0x1b9   : > { %v583_v40 = vpop.eup %582 }
 0x1ba   : > { %v346_v41 = vmul.f32 %v581_v34, %v345_v39  ;;  %v352_v42 = vmul.f32 %v583_v40, %v340_v35  ;;  %vm358_vm5 = vweird.f32 %v583_v40 }
 0x1bb   : > { %vm359_vm8 = vmor %vm357_vm6, %vm358_vm5 }
 0x1bc   : > { %v350_v44 = vsel %vm349_vm4, %v581_v34, %v346_v41  ;;  %v353_v45 = vmul.f32 %v583_v40, %v352_v42 }
 0x1bd   : > { %v361_v47 = vmul.f32 %v350_v44, %v327_v21 }
 0x1be   : > { %v354_v48 = vmul.f32 0.5, %v353_v45 }
 0x1bf   : > { %v367_v49 = vmul.f32 %v576_v43, %v361_v47 }
 0x1c0   : > { %v355_v50 = vsub.f32 1.5, %v354_v48 }
 0x1c1   : > { %v373_v51 = vadd.f32 %v577_v46, %v367_v49 }
 0x1c2   : > { %v356_v52 = vmul.f32 %v583_v40, %v355_v50 }
 0x1c3   : > { %v375_v53 = vpack.c.bf16 %v373_v51, %v373_v51 }
 0x1c4   : > { %v360_v54 = vsel %vm359_vm8, %v583_v40, %v356_v52 }
 0x1c5   : > { %v362_v55 = vmul.f32 %v360_v54, %v328_v26  ;;  %378 = vst.msk [vmem:[%s261_s26] sm:$0xf] %vm377_vm7, %v375_v53 }
 0x1c7   : > { %v368_v56 = vmul.f32 %v576_v43, %v362_v55 }
 0x1c9   : > { %v374_v57 = vadd.f32 %v577_v46, %v368_v56 }
 0x1cb   : > { %v376_v58 = vpack.c.bf16 %v374_v57, %v374_v57 }
 0x1cd   : > { %379 = vst.msk [vmem:[%s261_s26 + $0x4] sm:$0xf] %vm377_vm7, %v376_v58 }
 0x1ce   : > { %671 = shalt.err (!%p668_p10)
}
 0x1cf   : > { %s720_s28 = smov 64   ;;  %s721_s6 = smov 4  }
 0x1d0   : > { %519 = dma.vmem_to_hbm [thread:$0]  (%p821_p3), %s394_s14, 128, %s396_s11, %s381_s22, %s720_s28, %s720_s28, %s721_s6  }
 0x1d1 PF: > { %s410_s10 = sand.u32 1, %s702_s18   ;;  %p927_p12 = scmp.ge.s32.totalorder %s714_s21, 2 }
 0x1d2   : > { %s411_s17 = scalar_lea.sflag [#allocation4], %s410_s10 }
 0x1d3   : > { %p530_p13 = pnand %p927_p12, %p787_p6 }
 0x1d5   : > { %p531_p0 = pneg %p530_p13 }
 0x1d7   : > { %697 = dma.done.wait (%p531_p0), %s411_s17, 128  }
 0x1d8   : > { %699 = vsyncadd (%p531_p0), %s411_s17, 4294967168  ;;  %p19_p5 = scmp.ge.s32.totalorder %s805_s7, 4   ;;  %s928_s18 = smov %s706_s19 }
 0x1d9   : > { %s929_s19 = smov %s710_s20  ;;  %s930_s20 = smov %s817_s12 }
 0x1da   : > { %s931_s21 = smov %s805_s7  ;;  %21 = sbr.rel (!%p19_p5) target bundleno = 6 (0x6), region = 89 }
 0x1df   :  { %417 = vsyncpa [#allocation3], 1 }
 0x1e0   :  { %419 = vsyncpa [#allocation3 + $0x1], 1 }
 0x1e1   :  { %420 = vsyncpa [#allocation6], 1 }
 0x1e2   :  { %421 = vsyncpa [#allocation4], 1 }
 0x1e3   :  { %423 = vsyncpa [#allocation4 + $0x1], 1 }

</bundles_post_ra>
